<compile_context>
chip_gen: v6e
topology: v6e:2x2x1
jax: 0.10.0
libtpu: 0.0.40
codegen_flags: <defaults>
</compile_context>

<pallas_src>
import math

import jax
import jax.numpy as jnp
from jax.experimental import pallas as pl
from jax.experimental.pallas import tpu as pltpu

HEADS = 4
DH = 75                   # size_per_head == key_size
HPAD = 128                # per-head lane padding (75 -> 128)
EMB = HEADS * DH          # 300
PROJ = HEADS * HPAD       # 512 (head-padded projection width)
OUT = 200                 # fc output dim
OUT_PAD = 256             # lane-dense padded output dim (sliced back to 200 in wrapper)


def _round_up(x, m):
    return (x + m - 1) // m * m


def _pad_heads_last(a):
    """[..., 300] -> [..., 512]: zero-pad each 75-wide head slice to 128 lanes."""
    lead = a.shape[:-1]
    a = a.reshape(lead + (HEADS, DH))
    a = jnp.pad(a, [(0, 0)] * len(lead) + [(0, 0), (0, HPAD - DH)])
    return a.reshape(lead + (PROJ,))


def _vmem_budget_bytes(S, tq):
    """Right-sized scoped-VMEM request: resident K^T/V + weights (double-buffered by the
    default pipeline), pipelined q/out tiles, and per-head [tq, S] f32 score temps."""
    bf, f4 = 2, 4
    resident = (2 * PROJ * S * bf          # K^T + V (bf16)
                + EMB * PROJ * bf          # Wq (bf16)
                + PROJ * OUT_PAD * bf      # Wfc (bf16)
                + (PROJ + OUT_PAD) * f4)   # biases (f32)
    tiles = 2 * (tq * EMB * bf + tq * OUT_PAD * bf)      # double-buffered in/out tiles
    working = (tq * PROJ * (f4 + bf)                      # Q projection (f32 + bf16)
               + tq * S * (2 * f4 + bf)                   # scores, exp, bf16 P
               + tq * PROJ * bf)                          # per-head outputs
    est = int(1.5 * (2 * resident + tiles + working))     # residents double-buffered
    return max(8 << 20, min(32 << 20, est))               # clamp: safe on v5e/v6e/v7x


def _attention_fc_kernel(xq_ref, kT_ref, v_ref, wq_ref, bq_ref, wfc_ref, bfc_ref, o_ref):
    # Q projection for this query tile only; scale 1/sqrt(75) is folded into Wq/bq.
    # Head h occupies lanes [128h, 128h+75); padded lanes are exactly zero.
    q = jnp.dot(xq_ref[...], wq_ref[...], preferred_element_type=jnp.float32) + bq_ref[...]
    q = q.astype(jnp.bfloat16)                             # [tq, 512]

    heads = []
    for h in range(HEADS):                                 # static unroll
        lo = h * HPAD
        qh = q[:, lo:lo + HPAD]                            # [tq, 128]  lane-aligned slice
        kth = kT_ref[lo:lo + HPAD, :]                      # [128, S]   pre-transposed K
        vh = v_ref[:, lo:lo + HPAD]                        # [S, 128]

        # NN score matmul (no XLU transpose), softmax over keys in f32.
        s = jnp.dot(qh, kth, preferred_element_type=jnp.float32)      # [tq, S]
        s = s - jnp.max(s, axis=-1, keepdims=True)
        p = jnp.exp(s)
        p = p * pl.reciprocal(jnp.sum(p, axis=-1, keepdims=True), approx=True)

        oh = jnp.dot(p.astype(jnp.bfloat16), vh,
                     preferred_element_type=jnp.float32)   # [tq, 128] (pad lanes stay 0)
        heads.append(oh.astype(jnp.bfloat16))

    attn = jnp.concatenate(heads, axis=-1)                 # [tq, 512] bf16, 128-aligned
    out = jnp.dot(attn, wfc_ref[...], preferred_element_type=jnp.float32) + bfc_ref[...]
    o_ref[...] = out.astype(jnp.bfloat16)                  # lane-dense [tq, 256] bf16 store


def text_sentiment_forward(token_ids, params, *, max_q_tile=256):
    """token_ids: [B, S] int32 (batch-first). Returns [1, S, 200] like the PyTorch module."""
    # BasicAttention only attends over batch element 0 (input[:1]) -> gather only its rows.
    # Embedding table pre-cast to bf16 so the gather itself is bf16 (half the HBM traffic).
    emb_bf = params["embedding"].astype(jnp.bfloat16)
    x_bf = jnp.take(emb_bf, token_ids[0], axis=0)          # [S, 300] bf16
    S = x_bf.shape[0]
    # nn.Dropout(0.5): identity at inference time.

    scale = 1.0 / math.sqrt(DH)
    # Head-padded Q projection weights (scale folded in).
    wq_pad = _pad_heads_last(params["wq"] * scale).astype(jnp.bfloat16)   # [300, 512]
    bq_pad = _pad_heads_last(params["bq"] * scale)[None, :]               # f32 [1, 512]

    # --- K/V projections hoisted out of the grid loop (grid-invariant) ---------------
    wk_bf = params["wk"].astype(jnp.bfloat16)
    wv_bf = params["wv"].astype(jnp.bfloat16)
    k = jnp.dot(x_bf, wk_bf, preferred_element_type=jnp.float32) + params["bk"]   # [S,300]
    v = jnp.dot(x_bf, wv_bf, preferred_element_type=jnp.float32) + params["bv"]   # [S,300]
    k_pad = _pad_heads_last(k).astype(jnp.bfloat16)                               # [S,512]
    v_pad = _pad_heads_last(v).astype(jnp.bfloat16)                               # [S,512]
    # Per-head K^T, head-padded to 128 sublanes: rows [128h, 128h+75) hold head h.
    kT_pad = k_pad.reshape(S, HEADS, HPAD).transpose(1, 2, 0).reshape(PROJ, S)    # [512,S]

    # Final fc weights: rows re-laid-out onto the head-padded 512 positions, cols -> 256.
    wfc_hp = jnp.pad(params["wfc"].reshape(HEADS, DH, OUT),
                     ((0, 0), (0, HPAD - DH), (0, 0))).reshape(PROJ, OUT)
    wfc_pad = jnp.pad(wfc_hp, ((0, 0), (0, OUT_PAD - OUT))).astype(jnp.bfloat16)  # [512,256]
    bfc_pad = jnp.pad(params["bfc"], (0, OUT_PAD - OUT))[None, :]                 # f32 [1,256]

    # Query tile: multiple of 8; shrink for long S so [tq,S] f32 scores + resident K/V
    # fit v7x's 64 MiB VMEM (v5e/v6e have 128 MiB and keep the bigger tile).
    tq_cap = max_q_tile if S <= 4096 else min(max_q_tile, 128)
    tq = min(tq_cap, _round_up(S, 8))
    S_pad = _round_up(S, tq)
    xq = x_bf if S_pad == S else jnp.pad(x_bf, ((0, S_pad - S), (0, 0)))

    out = pl.pallas_call(
        _attention_fc_kernel,
        out_shape=jax.ShapeDtypeStruct((S_pad, OUT_PAD), jnp.bfloat16),
        grid_spec=pltpu.PrefetchScalarGridSpec(
            num_scalar_prefetch=0,
            grid=(S_pad // tq,),
            in_specs=[
                pl.BlockSpec((tq, EMB), lambda i: (i, 0)),        # query tile (pipelined)
                pl.BlockSpec((PROJ, S), lambda i: (0, 0)),        # K^T (resident)
                pl.BlockSpec((S, PROJ), lambda i: (0, 0)),        # V   (resident)
                pl.BlockSpec((EMB, PROJ), lambda i: (0, 0)),      # Wq  (resident)
                pl.BlockSpec((1, PROJ), lambda i: (0, 0)),        # bq
                pl.BlockSpec((PROJ, OUT_PAD), lambda i: (0, 0)),  # Wfc (padded)
                pl.BlockSpec((1, OUT_PAD), lambda i: (0, 0)),     # bfc (padded)
            ],
            out_specs=pl.BlockSpec((tq, OUT_PAD), lambda i: (i, 0)),
        ),
        compiler_params=pltpu.CompilerParams(
            dimension_semantics=("parallel",),                    # q-tiles shard on v7x's 2 TCs
            vmem_limit_bytes=_vmem_budget_bytes(S, tq),
        ),
    )(xq, kT_pad, v_pad, wq_pad, bq_pad, wfc_pad, bfc_pad)
    return out[:S, :OUT].astype(jnp.float32)[None]                # [1, S, 200] f32


def init_params(key, vocab_size):
    """Deterministic synthetic parameters (shapes match the PyTorch module, weights as [in,out])."""
    ks = jax.random.split(key, 9)

    def linear_w(k, fan_in, fan_out):
        bound = 1.0 / math.sqrt(fan_in)
        return jax.random.uniform(k, (fan_in, fan_out), jnp.float32, -bound, bound)

    def linear_b(k, fan_in, fan_out):
        bound = 1.0 / math.sqrt(fan_in)
        return jax.random.uniform(k, (fan_out,), jnp.float32, -bound, bound)

    emb = jax.random.normal(ks[0], (vocab_size, EMB), jnp.float32)
    return dict(
        embedding=emb,
        wq=linear_w(ks[1], EMB, EMB), bq=linear_b(ks[2], EMB, EMB),
        wk=linear_w(ks[3], EMB, EMB), bk=linear_b(ks[4], EMB, EMB),
        wv=linear_w(ks[5], EMB, EMB), bv=linear_b(ks[6], EMB, EMB),
        wfc=linear_w(ks[7], EMB, OUT), bfc=linear_b(ks[8], EMB, OUT),
    )


def reference_forward(token_ids, params):
    """Pure-JAX f32 reference matching the PyTorch semantics."""
    x = jnp.take(params["embedding"], token_ids[0], axis=0)        # [S, 300]
    q = x @ params["wq"] + params["bq"]
    k = x @ params["wk"] + params["bk"]
    v = x @ params["wv"] + params["bv"]
    outs = []
    for h in range(HEADS):
        lo = h * DH
        qh, kh, vh = q[:, lo:lo + DH], k[:, lo:lo + DH], v[:, lo:lo + DH]
        s = (qh @ kh.T) / math.sqrt(DH)
        outs.append(jax.nn.softmax(s, axis=-1) @ vh)
    attn = jnp.concatenate(outs, axis=-1)                          # [S, 300]
    return (attn @ params["wfc"] + params["bfc"])[None]            # [1, S, 200]


if __name__ == "__main__":
    VOCAB = 50
    B, S = 2, 8

    key = jax.random.PRNGKey(0)
    k_params, k_tokens = jax.random.split(key)
    params = init_params(k_params, VOCAB)
    token_ids = jax.random.randint(k_tokens, (B, S), 0, VOCAB, dtype=jnp.int32)

    out = text_sentiment_forward(token_ids, params)
    out = jax.block_until_ready(out)
    assert out.shape == (1, S, OUT), out.shape

    ref = reference_forward(token_ids, params)
    max_err = float(jnp.max(jnp.abs(out - ref)))
    assert max_err < 3e-2, f"mismatch vs reference: {max_err}"

    print("KERNEL_OK")
</pallas_src>

<mosaic_0001>
module attributes {stable_mosaic.version = 11 : i64} {
  func.func @_attention_fc_kernel(%arg0: i32, %arg1: memref<8x300xbf16, #tpu.memory_space<vmem>>, %arg2: memref<512x8xbf16, #tpu.memory_space<vmem>>, %arg3: memref<8x512xbf16, #tpu.memory_space<vmem>>, %arg4: memref<300x512xbf16, #tpu.memory_space<vmem>>, %arg5: memref<1x512xf32, #tpu.memory_space<vmem>>, %arg6: memref<512x256xbf16, #tpu.memory_space<vmem>>, %arg7: memref<1x256xf32, #tpu.memory_space<vmem>>, %arg8: memref<8x256xbf16, #tpu.memory_space<vmem>>) attributes {dimension_semantics = [#tpu.dimension_semantics<parallel>], iteration_bounds = array<i64: 1>, scalar_prefetch = 0 : i64, scratch_operands = 0 : i64, tpu.core_type = #tpu.core_type<tc>, window_params = [{transform_indices = @transform_0, window_bounds = array<i64: 8, 300>}, {pipeline_mode = #tpu.pipeline_mode<synchronous>, transform_indices = @transform_1, window_bounds = array<i64: 512, 8>}, {pipeline_mode = #tpu.pipeline_mode<synchronous>, transform_indices = @transform_2, window_bounds = array<i64: 8, 512>}, {pipeline_mode = #tpu.pipeline_mode<synchronous>, transform_indices = @transform_3, window_bounds = array<i64: 300, 512>}, {pipeline_mode = #tpu.pipeline_mode<synchronous>, transform_indices = @transform_4, window_bounds = array<i64: 1, 512>}, {pipeline_mode = #tpu.pipeline_mode<synchronous>, transform_indices = @transform_5, window_bounds = array<i64: 512, 256>}, {pipeline_mode = #tpu.pipeline_mode<synchronous>, transform_indices = @transform_6, window_bounds = array<i64: 1, 256>}, {transform_indices = @transform_7, window_bounds = array<i64: 8, 256>}]} {
    %c0 = arith.constant 0 : index
    %c0_0 = arith.constant 0 : index
    %0 = vector.load %arg1[%c0, %c0_0] : memref<8x300xbf16, #tpu.memory_space<vmem>>, vector<8x300xbf16>
    %c0_1 = arith.constant 0 : index
    %c0_2 = arith.constant 0 : index
    %1 = vector.load %arg4[%c0_1, %c0_2] : memref<300x512xbf16, #tpu.memory_space<vmem>>, vector<300x512xbf16>
    %cst = arith.constant dense<0.000000e+00> : vector<8x512xf32>
    %2 = tpu.matmul %0, %1, %cst {dimension_numbers = #tpu.dot_dimension_numbers<[1], [0], [0], [1], [0, 0, 1, 1], [], []>} : vector<8x300xbf16>, vector<300x512xbf16>, vector<8x512xf32> -> vector<8x512xf32>
    %c0_3 = arith.constant 0 : index
    %c0_4 = arith.constant 0 : index
    %3 = vector.load %arg5[%c0_3, %c0_4] : memref<1x512xf32, #tpu.memory_space<vmem>>, vector<1x512xf32>
    %4 = vector.broadcast %3 : vector<1x512xf32> to vector<8x512xf32>
    %5 = arith.addf %2, %4 : vector<8x512xf32>
    %6 = arith.truncf %5 : vector<8x512xf32> to vector<8x512xbf16>
    %7 = vector.extract_strided_slice %6 {offsets = [0, 0], sizes = [8, 128], strides = [1, 1]} : vector<8x512xbf16> to vector<8x128xbf16>
    %c0_5 = arith.constant 0 : index
    %c0_6 = arith.constant 0 : index
    %8 = vector.load %arg2[%c0_5, %c0_6] : memref<512x8xbf16, #tpu.memory_space<vmem>>, vector<128x8xbf16>
    %c0_7 = arith.constant 0 : index
    %c0_8 = arith.constant 0 : index
    %9 = vector.load %arg3[%c0_7, %c0_8] : memref<8x512xbf16, #tpu.memory_space<vmem>>, vector<8x128xbf16>
    %cst_9 = arith.constant dense<0.000000e+00> : vector<8x8xf32>
    %10 = tpu.matmul %7, %8, %cst_9 {dimension_numbers = #tpu.dot_dimension_numbers<[1], [0], [0], [1], [0, 0, 1, 1], [], []>} : vector<8x128xbf16>, vector<128x8xbf16>, vector<8x8xf32> -> vector<8x8xf32>
    %cst_10 = arith.constant dense<0xFF800000> : vector<8xf32>
    %11 = vector.multi_reduction <maximumf>, %10, %cst_10 [1] : vector<8x8xf32> to vector<8xf32>
    %12 = vector.shape_cast %11 : vector<8xf32> to vector<8x1xf32>
    %13 = vector.broadcast %12 : vector<8x1xf32> to vector<8x8xf32>
    %14 = arith.subf %10, %13 : vector<8x8xf32>
    %15 = math.exp %14 : vector<8x8xf32>
    %cst_11 = arith.constant dense<0.000000e+00> : vector<8xf32>
    %16 = vector.multi_reduction <add>, %15, %cst_11 [1] : vector<8x8xf32> to vector<8xf32>
    %17 = vector.shape_cast %16 : vector<8xf32> to vector<8x1xf32>
    %18 = tpu.reciprocal %17 {approx = true} : vector<8x1xf32> -> vector<8x1xf32>
    %19 = vector.broadcast %18 : vector<8x1xf32> to vector<8x8xf32>
    %20 = arith.mulf %15, %19 : vector<8x8xf32>
    %21 = arith.truncf %20 : vector<8x8xf32> to vector<8x8xbf16>
    %cst_12 = arith.constant dense<0.000000e+00> : vector<8x128xf32>
    %22 = tpu.matmul %21, %9, %cst_12 {dimension_numbers = #tpu.dot_dimension_numbers<[1], [0], [0], [1], [0, 0, 1, 1], [], []>} : vector<8x8xbf16>, vector<8x128xbf16>, vector<8x128xf32> -> vector<8x128xf32>
    %23 = arith.truncf %22 : vector<8x128xf32> to vector<8x128xbf16>
    %24 = vector.extract_strided_slice %6 {offsets = [0, 128], sizes = [8, 128], strides = [1, 1]} : vector<8x512xbf16> to vector<8x128xbf16>
    %c128 = arith.constant 128 : index
    %c0_13 = arith.constant 0 : index
    %25 = vector.load %arg2[%c128, %c0_13] : memref<512x8xbf16, #tpu.memory_space<vmem>>, vector<128x8xbf16>
    %c0_14 = arith.constant 0 : index
    %c128_15 = arith.constant 128 : index
    %26 = vector.load %arg3[%c0_14, %c128_15] : memref<8x512xbf16, #tpu.memory_space<vmem>>, vector<8x128xbf16>
    %cst_16 = arith.constant dense<0.000000e+00> : vector<8x8xf32>
    %27 = tpu.matmul %24, %25, %cst_16 {dimension_numbers = #tpu.dot_dimension_numbers<[1], [0], [0], [1], [0, 0, 1, 1], [], []>} : vector<8x128xbf16>, vector<128x8xbf16>, vector<8x8xf32> -> vector<8x8xf32>
    %cst_17 = arith.constant dense<0xFF800000> : vector<8xf32>
    %28 = vector.multi_reduction <maximumf>, %27, %cst_17 [1] : vector<8x8xf32> to vector<8xf32>
    %29 = vector.shape_cast %28 : vector<8xf32> to vector<8x1xf32>
    %30 = vector.broadcast %29 : vector<8x1xf32> to vector<8x8xf32>
    %31 = arith.subf %27, %30 : vector<8x8xf32>
    %32 = math.exp %31 : vector<8x8xf32>
    %cst_18 = arith.constant dense<0.000000e+00> : vector<8xf32>
    %33 = vector.multi_reduction <add>, %32, %cst_18 [1] : vector<8x8xf32> to vector<8xf32>
    %34 = vector.shape_cast %33 : vector<8xf32> to vector<8x1xf32>
    %35 = tpu.reciprocal %34 {approx = true} : vector<8x1xf32> -> vector<8x1xf32>
    %36 = vector.broadcast %35 : vector<8x1xf32> to vector<8x8xf32>
    %37 = arith.mulf %32, %36 : vector<8x8xf32>
    %38 = arith.truncf %37 : vector<8x8xf32> to vector<8x8xbf16>
    %cst_19 = arith.constant dense<0.000000e+00> : vector<8x128xf32>
    %39 = tpu.matmul %38, %26, %cst_19 {dimension_numbers = #tpu.dot_dimension_numbers<[1], [0], [0], [1], [0, 0, 1, 1], [], []>} : vector<8x8xbf16>, vector<8x128xbf16>, vector<8x128xf32> -> vector<8x128xf32>
    %40 = arith.truncf %39 : vector<8x128xf32> to vector<8x128xbf16>
    %41 = vector.extract_strided_slice %6 {offsets = [0, 256], sizes = [8, 128], strides = [1, 1]} : vector<8x512xbf16> to vector<8x128xbf16>
    %c256 = arith.constant 256 : index
    %c0_20 = arith.constant 0 : index
    %42 = vector.load %arg2[%c256, %c0_20] : memref<512x8xbf16, #tpu.memory_space<vmem>>, vector<128x8xbf16>
    %c0_21 = arith.constant 0 : index
    %c256_22 = arith.constant 256 : index
    %43 = vector.load %arg3[%c0_21, %c256_22] : memref<8x512xbf16, #tpu.memory_space<vmem>>, vector<8x128xbf16>
    %cst_23 = arith.constant dense<0.000000e+00> : vector<8x8xf32>
    %44 = tpu.matmul %41, %42, %cst_23 {dimension_numbers = #tpu.dot_dimension_numbers<[1], [0], [0], [1], [0, 0, 1, 1], [], []>} : vector<8x128xbf16>, vector<128x8xbf16>, vector<8x8xf32> -> vector<8x8xf32>
    %cst_24 = arith.constant dense<0xFF800000> : vector<8xf32>
    %45 = vector.multi_reduction <maximumf>, %44, %cst_24 [1] : vector<8x8xf32> to vector<8xf32>
    %46 = vector.shape_cast %45 : vector<8xf32> to vector<8x1xf32>
    %47 = vector.broadcast %46 : vector<8x1xf32> to vector<8x8xf32>
    %48 = arith.subf %44, %47 : vector<8x8xf32>
    %49 = math.exp %48 : vector<8x8xf32>
    %cst_25 = arith.constant dense<0.000000e+00> : vector<8xf32>
    %50 = vector.multi_reduction <add>, %49, %cst_25 [1] : vector<8x8xf32> to vector<8xf32>
    %51 = vector.shape_cast %50 : vector<8xf32> to vector<8x1xf32>
    %52 = tpu.reciprocal %51 {approx = true} : vector<8x1xf32> -> vector<8x1xf32>
    %53 = vector.broadcast %52 : vector<8x1xf32> to vector<8x8xf32>
    %54 = arith.mulf %49, %53 : vector<8x8xf32>
    %55 = arith.truncf %54 : vector<8x8xf32> to vector<8x8xbf16>
    %cst_26 = arith.constant dense<0.000000e+00> : vector<8x128xf32>
    %56 = tpu.matmul %55, %43, %cst_26 {dimension_numbers = #tpu.dot_dimension_numbers<[1], [0], [0], [1], [0, 0, 1, 1], [], []>} : vector<8x8xbf16>, vector<8x128xbf16>, vector<8x128xf32> -> vector<8x128xf32>
    %57 = arith.truncf %56 : vector<8x128xf32> to vector<8x128xbf16>
    %58 = vector.extract_strided_slice %6 {offsets = [0, 384], sizes = [8, 128], strides = [1, 1]} : vector<8x512xbf16> to vector<8x128xbf16>
    %c384 = arith.constant 384 : index
    %c0_27 = arith.constant 0 : index
    %59 = vector.load %arg2[%c384, %c0_27] : memref<512x8xbf16, #tpu.memory_space<vmem>>, vector<128x8xbf16>
    %c0_28 = arith.constant 0 : index
    %c384_29 = arith.constant 384 : index
    %60 = vector.load %arg3[%c0_28, %c384_29] : memref<8x512xbf16, #tpu.memory_space<vmem>>, vector<8x128xbf16>
    %cst_30 = arith.constant dense<0.000000e+00> : vector<8x8xf32>
    %61 = tpu.matmul %58, %59, %cst_30 {dimension_numbers = #tpu.dot_dimension_numbers<[1], [0], [0], [1], [0, 0, 1, 1], [], []>} : vector<8x128xbf16>, vector<128x8xbf16>, vector<8x8xf32> -> vector<8x8xf32>
    %cst_31 = arith.constant dense<0xFF800000> : vector<8xf32>
    %62 = vector.multi_reduction <maximumf>, %61, %cst_31 [1] : vector<8x8xf32> to vector<8xf32>
    %63 = vector.shape_cast %62 : vector<8xf32> to vector<8x1xf32>
    %64 = vector.broadcast %63 : vector<8x1xf32> to vector<8x8xf32>
    %65 = arith.subf %61, %64 : vector<8x8xf32>
    %66 = math.exp %65 : vector<8x8xf32>
    %cst_32 = arith.constant dense<0.000000e+00> : vector<8xf32>
    %67 = vector.multi_reduction <add>, %66, %cst_32 [1] : vector<8x8xf32> to vector<8xf32>
    %68 = vector.shape_cast %67 : vector<8xf32> to vector<8x1xf32>
    %69 = tpu.reciprocal %68 {approx = true} : vector<8x1xf32> -> vector<8x1xf32>
    %70 = vector.broadcast %69 : vector<8x1xf32> to vector<8x8xf32>
    %71 = arith.mulf %66, %70 : vector<8x8xf32>
    %72 = arith.truncf %71 : vector<8x8xf32> to vector<8x8xbf16>
    %cst_33 = arith.constant dense<0.000000e+00> : vector<8x128xf32>
    %73 = tpu.matmul %72, %60, %cst_33 {dimension_numbers = #tpu.dot_dimension_numbers<[1], [0], [0], [1], [0, 0, 1, 1], [], []>} : vector<8x8xbf16>, vector<8x128xbf16>, vector<8x128xf32> -> vector<8x128xf32>
    %74 = arith.truncf %73 : vector<8x128xf32> to vector<8x128xbf16>
    %75 = tpu.concatenate %23, %40, %57, %74 in 1 : vector<8x128xbf16>, vector<8x128xbf16>, vector<8x128xbf16>, vector<8x128xbf16> -> vector<8x512xbf16>
    %c0_34 = arith.constant 0 : index
    %c0_35 = arith.constant 0 : index
    %76 = vector.load %arg6[%c0_34, %c0_35] : memref<512x256xbf16, #tpu.memory_space<vmem>>, vector<512x256xbf16>
    %cst_36 = arith.constant dense<0.000000e+00> : vector<8x256xf32>
    %77 = tpu.matmul %75, %76, %cst_36 {dimension_numbers = #tpu.dot_dimension_numbers<[1], [0], [0], [1], [0, 0, 1, 1], [], []>} : vector<8x512xbf16>, vector<512x256xbf16>, vector<8x256xf32> -> vector<8x256xf32>
    %c0_37 = arith.constant 0 : index
    %c0_38 = arith.constant 0 : index
    %78 = vector.load %arg7[%c0_37, %c0_38] : memref<1x256xf32, #tpu.memory_space<vmem>>, vector<1x256xf32>
    %79 = vector.broadcast %78 : vector<1x256xf32> to vector<8x256xf32>
    %80 = arith.addf %77, %79 : vector<8x256xf32>
    %81 = arith.truncf %80 : vector<8x256xf32> to vector<8x256xbf16>
    %c0_39 = arith.constant 0 : index
    %c0_40 = arith.constant 0 : index
    %82 = vector.load %arg8[%c0_39, %c0_40] : memref<8x256xbf16, #tpu.memory_space<vmem>>, vector<8x256xbf16>
    tpu.vector_store %arg8[%c0_39, %c0_40], %81 {strides = array<i32>} : memref<8x256xbf16, #tpu.memory_space<vmem>>, vector<8x256xbf16>,
    return
  }
  func.func @transform_0(%arg0: i32) -> (i32, i32) {
    %c0_i32 = arith.constant 0 : i32
    %c0_i32_0 = arith.constant 0 : i32
    return %arg0, %c0_i32 : i32, i32
  }
  func.func @transform_1(%arg0: i32) -> (i32, i32) {
    %c0_i32 = arith.constant 0 : i32
    %c0_i32_0 = arith.constant 0 : i32
    %c0_i32_1 = arith.constant 0 : i32
    return %c0_i32, %c0_i32_0 : i32, i32
  }
  func.func @transform_2(%arg0: i32) -> (i32, i32) {
    %c0_i32 = arith.constant 0 : i32
    %c0_i32_0 = arith.constant 0 : i32
    %c0_i32_1 = arith.constant 0 : i32
    return %c0_i32, %c0_i32_0 : i32, i32
  }
  func.func @transform_3(%arg0: i32) -> (i32, i32) {
    %c0_i32 = arith.constant 0 : i32
    %c0_i32_0 = arith.constant 0 : i32
    %c0_i32_1 = arith.constant 0 : i32
    return %c0_i32, %c0_i32_0 : i32, i32
  }
  func.func @transform_4(%arg0: i32) -> (i32, i32) {
    %c0_i32 = arith.constant 0 : i32
    %c0_i32_0 = arith.constant 0 : i32
    %c0_i32_1 = arith.constant 0 : i32
    return %c0_i32, %c0_i32_0 : i32, i32
  }
  func.func @transform_5(%arg0: i32) -> (i32, i32) {
    %c0_i32 = arith.constant 0 : i32
    %c0_i32_0 = arith.constant 0 : i32
    %c0_i32_1 = arith.constant 0 : i32
    return %c0_i32, %c0_i32_0 : i32, i32
  }
  func.func @transform_6(%arg0: i32) -> (i32, i32) {
    %c0_i32 = arith.constant 0 : i32
    %c0_i32_0 = arith.constant 0 : i32
    %c0_i32_1 = arith.constant 0 : i32
    return %c0_i32, %c0_i32_0 : i32, i32
  }
  func.func @transform_7(%arg0: i32) -> (i32, i32) {
    %c0_i32 = arith.constant 0 : i32
    %c0_i32_0 = arith.constant 0 : i32
    return %arg0, %c0_i32 : i32, i32
  }
}

</mosaic_0001>

<bundles_post_ra>
// kernel: tpu_custom_call.1
= control target key start
LH: loop header
LB: loop body
LE: loop exit
PB: predicated region body
PF: predicated region fallthrough
CT: control target
= control target key end

     0   :  { %12 = vsyncpa [#allocation3], 0  ;;  %s2865_s0 = inlined_call_operand.vmem [shape: bf16[8,300], index: 0, kind: input, shape index: {}]   ;;  %s2866_s1 = inlined_call_operand.vmem [shape: bf16[512,8], index: 1, kind: input, shape index: {}]   ;;  %s2867_s2 = inlined_call_operand.vmem [shape: bf16[8,512], index: 2, kind: input, shape index: {}]   ;;  %s2868_s3 = inlined_call_operand.hbm [shape: bf16[300,512], index: 3, kind: input, shape index: {}]   ;;  %s2869_s4 = inlined_call_operand.vmem [shape: f32[1,512], index: 4, kind: input, shape index: {}]   ;;  %s2870_s5 = inlined_call_operand.hbm [shape: bf16[512,256], index: 5, kind: input, shape index: {}]   ;;  %s2871_s6 = inlined_call_operand.vmem [shape: f32[1,256], index: 6, kind: input, shape index: {}]   ;;  %s2872_s7 = inlined_call_operand.hbm [shape: bf16[8,256], index: 7, kind: output, shape index: {}]  }
   0x1   :  { %13 = vsyncpa [#allocation6], 0 }
   0x2   :  { %14 = vsyncpa [#allocation4], 0  ;;  %s2558_s24 = smov [#allocation2]  }
   0x3   :  { %s26_s25 = sshll.u32 %s2558_s24, 4  ;;  %s27_s25 = int_to_ptr.vmem [resolvable:$true] %s26_s25 }
   0x4   :  { %s2500_s26 = scalar_lea.vmem %s27_s25, 9728  ;;  %p2505_p1 = scmp.lt.s32.totalorder %s27_s25, %s27_s25 }
   0x5   :  { %p2501_p0 = scmp.ne.s32.totalorder %s27_s25, %s2500_s26  ;;  %p2506_p2 = scmp.lt.s32.totalorder %s2500_s26, %s2500_s26 }
   0x7   :  { %p2507_p3 = por %p2506_p2, %p2505_p1 }
   0x9   :  { %p2508_p4 = pnand %p2507_p3, %p2501_p0 }
   0xb   :  { %2511 = shalt.err (!%p2508_p4)
}
   0xc   :  { %s2559_s27 = smov 256   ;;  %s2560_s28 = smov 16  }
   0xd   :  { %32 = dma.hbm_to_vmem [thread:$0]  %s2868_s3, 9728, %s27_s25, [#allocation3], %s2559_s27, %s2559_s27, %s2560_s28  }
   0xe   :  { %s2561_s8 = smov [#allocation5]  }
   0xf   :  { %s40_s9 = sshll.u32 %s2561_s8, 4  ;;  %s41_s9 = int_to_ptr.vmem [resolvable:$true] %s40_s9 }
  0x10   :  { %s2520_s10 = scalar_lea.vmem %s41_s9, 8192  ;;  %p2525_p6 = scmp.lt.s32.totalorder %s41_s9, %s41_s9 }
  0x11   :  { %p2521_p5 = scmp.ne.s32.totalorder %s41_s9, %s2520_s10  ;;  %p2526_p7 = scmp.lt.s32.totalorder %s2520_s10, %s2520_s10 }
  0x13   :  { %p2527_p8 = por %p2526_p7, %p2525_p6 }
  0x15   :  { %p2528_p9 = pnand %p2527_p8, %p2521_p5 }
  0x17   :  { %2531 = shalt.err (!%p2528_p9)
}
  0x18   :  { %s2562_s11 = smov 128   ;;  %s2563_s12 = smov 8  }
  0x19   :  { %46 = dma.hbm_to_vmem [thread:$0]  %s2870_s5, 8192, %s41_s9, [#allocation6], %s2562_s11, %s2562_s11, %s2563_s12  }
  0x1a   :  { %2552 = dma.done.wait [#allocation3], 9728  }
  0x1b   :  { %2553 = vsyncadd [#allocation3], 4294957568 }
  0x1c   :  { %2554 = dma.done.wait [#allocation6], 8192  }
  0x1d   :  { %2555 = vsyncadd [#allocation6], 4294959104  ;;  %v2564_v0 = vmov 0   ;;  %v2231_v1 = vld [vmem:[#allocation2 + $0xe4] ss:$16 sps:$4 sm:$0xff]   ;;  %vm546_vm0 = vcmask 1045504  }
  0x1e   :  { %632 = vmatprep.mubr.bf16.mxu1 %v2564_v0  ;;  %v2233_v2 = vld [vmem:[#allocation2 + $0xe0] ss:$16 sps:$4 sm:$0xff]   ;;  %559 = vmatprep.subr.bf16.mxu0 %v2231_v1  ;;  %v2234_v3 = vld [vmem:[#allocation2 + $0xc4] ss:$16 sps:$4 sm:$0xff]   ;;  %v2293_v26 = vld [vmem:[#allocation2 + $0xec] ss:$16 sps:$4 sm:$0xff]  }
  0x1f   :  { %560 = vmatpush1.bf16.msra.mxu0 %v2233_v2  ;;  %v2236_v4 = vld [vmem:[#allocation2 + $0xc0] ss:$16 sps:$4 sm:$0xff]   ;;  %v2237_v5 = vld [vmem:[#allocation2 + $0xa4] ss:$16 sps:$4 sm:$0xff]   ;;  %v2627_v28 = vld [vmem:[%s2865_s0 + $0x8] ss:$0 sps:$4 sm:$0xff]  }
  0x20   :  { %561 = vmatprep.subr.bf16.mxu0 %v2234_v3  ;;  %v2239_v6 = vld [vmem:[#allocation2 + $0xa0] ss:$16 sps:$4 sm:$0xff]   ;;  %v2240_v7 = vld [vmem:[#allocation2 + $0x84] ss:$16 sps:$4 sm:$0xff]   ;;  %vm542_vm1 = vcmask 359424   ;;  %vm2566_vm2 = vmmov 0  }
  0x21   :  { %v2242_v8 = vld [vmem:[#allocation2 + $0x80] ss:$16 sps:$4 sm:$0xff]   ;;  %v2243_v9 = vld [vmem:[#allocation2 + $0x64] ss:$16 sps:$4 sm:$0xff]   ;;  %v2291_v29 = vld [vmem:[#allocation2 + $0xe8] ss:$16 sps:$4 sm:$0xff]  }
  0x22   :  { %v2245_v10 = vld [vmem:[#allocation2 + $0x60] ss:$16 sps:$4 sm:$0xff]   ;;  %v2246_v11 = vld [vmem:[#allocation2 + $0x44] ss:$16 sps:$4 sm:$0xff]   ;;  %v2296_v30 = vld [vmem:[#allocation2 + $0xcc] ss:$16 sps:$4 sm:$0xff]  }
  0x23   :  { %562 = vmatpush1.bf16.msra.mxu0 %v2236_v4  ;;  %v2269_v12 = vld [vmem:[#allocation2 + $0x244] ss:$16 sps:$4 sm:$0x3f]   ;;  %v2272_v13 = vld [vmem:[#allocation2 + $0x240] ss:$16 sps:$4 sm:$0x3f]  }
  0x24   :  { %563 = vmatprep.subr.bf16.mxu0 %v2237_v5  ;;  %v2248_v14 = vld [vmem:[#allocation2 + $0x40] ss:$16 sps:$4 sm:$0xff]   ;;  %1967 = vmatprep.subr.msk.bf16.mxu1 %vm546_vm0, %v2269_v12  ;;  %v2249_v15 = vld [vmem:[#allocation2 + $0x24] ss:$16 sps:$4 sm:$0xff]   ;;  %v548_v16 = vsel %vm546_vm0, %v2272_v13, 0  ;;  %v2348_v13 = vld [vmem:[%s2866_s1 + $0x38] sm:$0xff]  }
  0x25   :  { %v2275_v17 = vld [vmem:[#allocation2 + $0x224] ss:$16 sps:$4 sm:$0xff]   ;;  %611 = vmatpush1.bf16.msra.mxu1 %v548_v16  ;;  %v2278_v18 = vld [vmem:[#allocation2 + $0x220] ss:$16 sps:$4 sm:$0xff]   ;;  %v2294_v33 = vld [vmem:[#allocation2 + $0xc8] ss:$16 sps:$4 sm:$0xff]  }
  0x26   :  { %612 = vmatprep.subr.bf16.mxu1 %v2275_v17  ;;  %v2251_v19 = vld [vmem:[#allocation2 + $0x20] ss:$16 sps:$4 sm:$0xff]   ;;  %v2281_v20 = vld [vmem:[#allocation2 + $0x204] ss:$16 sps:$4 sm:$0xff]   ;;  %v2299_v34 = vld [vmem:[#allocation2 + $0xac] ss:$16 sps:$4 sm:$0xff]  }
  0x27   :  { %564 = vmatpush1.bf16.msra.mxu0 %v2239_v6  ;;  %v2252_v21 = vld [vmem:[#allocation2 + $0x4] ss:$16 sps:$4 sm:$0xff]   ;;  %v2284_v22 = vld [vmem:[#allocation2 + $0x200] ss:$16 sps:$4 sm:$0xff]   ;;  %v2297_v37 = vld [vmem:[#allocation2 + $0xa8] ss:$16 sps:$4 sm:$0xff]  }
  0x28   :  { %565 = vmatprep.subr.bf16.mxu0 %v2240_v7  ;;  %v2620_v23 = vld [vmem:[%s2865_s0] sm:$0xff]  ;;  %v2302_v38 = vld [vmem:[#allocation2 + $0x8c] ss:$16 sps:$4 sm:$0xff]   ;;  %v2300_v41 = vld [vmem:[#allocation2 + $0x88] ss:$16 sps:$4 sm:$0xff]   ;;  %v2565_v16 = vmov 0.0  }
  0x29   :  { %613 = vmatpush1.bf16.msra.mxu1 %v2278_v18  ;;  %v2254_v24 = vld [vmem:[#allocation2] ss:$16 sps:$4 sm:$0xff]   ;;  %v1889_v25 = vcombine.high %v2620_v23, %v2620_v23  ;;  %v2255_v27 = vld [vmem:[#allocation2 + $0x1e4] ss:$16 sps:$4 sm:$0xff]   ;;  %v2305_v42 = vld [vmem:[#allocation2 + $0x6c] ss:$16 sps:$4 sm:$0xff]   ;;  %v1888_v2 = vcombine.low %v2620_v23, %v2620_v23 }
  0x2a   :  { %614 = vmatprep.subr.bf16.mxu1 %v2281_v20  ;;  %v2257_v31 = vld [vmem:[#allocation2 + $0x1e0] ss:$16 sps:$4 sm:$0xff]   ;;  %v2258_v32 = vld [vmem:[#allocation2 + $0x1c4] ss:$16 sps:$4 sm:$0xff]   ;;  %v2303_v45 = vld [vmem:[#allocation2 + $0x68] ss:$16 sps:$4 sm:$0xff]  }
  0x2b   :  { %566 = vmatpush1.bf16.msra.mxu0 %v2242_v8  ;;  %591 = vmatprep.mubr.bf16.mxu0 %v1889_v25  ;;  %v2260_v35 = vld [vmem:[#allocation2 + $0x1c0] ss:$16 sps:$4 sm:$0xff]   ;;  %v2261_v36 = vld [vmem:[#allocation2 + $0x1a4] ss:$16 sps:$4 sm:$0xff]   ;;  %v2308_v46 = vld [vmem:[#allocation2 + $0x4c] ss:$16 sps:$4 sm:$0xff]  }
  0x2c   :  { %567 = vmatprep.subr.bf16.mxu0 %v2243_v9  ;;  %v2263_v39 = vld [vmem:[#allocation2 + $0x1a0] ss:$16 sps:$4 sm:$0xff]   ;;  %v2264_v40 = vld [vmem:[#allocation2 + $0x184] ss:$16 sps:$4 sm:$0xff]   ;;  %v2306_v50 = vld [vmem:[#allocation2 + $0x48] ss:$16 sps:$4 sm:$0xff]  }
  0x2d   :  { %615 = vmatpush1.bf16.msra.mxu1 %v2284_v22  ;;  %v2266_v43 = vld [vmem:[#allocation2 + $0x180] ss:$16 sps:$4 sm:$0xff]   ;;  %v2267_v44 = vld [vmem:[#allocation2 + $0x164] ss:$16 sps:$4 sm:$0xff]   ;;  %v2311_v51 = vld [vmem:[#allocation2 + $0x2c] ss:$16 sps:$4 sm:$0xff]  }
  0x2e   :  { %641 = vmatprep.subr.bf16.mxu1 %v2293_v26  ;;  %v2271_v47 = vld [vmem:[#allocation2 + $0x160] ss:$16 sps:$4 sm:$0xff]   ;;  %v2273_v48 = vld [vmem:[#allocation2 + $0x144] ss:$16 sps:$4 sm:$0xff]   ;;  %v2309_v55 = vld [vmem:[#allocation2 + $0x28] ss:$16 sps:$4 sm:$0xff]  }
  0x2f   :  { %568 = vmatpush1.bf16.msra.mxu0 %v2245_v10  ;;  %v2277_v49 = vld [vmem:[#allocation2 + $0x140] ss:$16 sps:$4 sm:$0xff]   ;;  %v2332_v52 = vld [vmem:[#allocation2 + $0x248] ss:$16 sps:$4 sm:$0x3f]   ;;  %vm832_vm3 = vcmask 64512  }
  0x30   :  { %569 = vmatprep.subr.bf16.mxu0 %v2246_v11  ;;  %1968 = vmatmul.mubr.msk.bf16.vlgmr.msra.gmra.mxu1 %vm542_vm1, %v2627_v28  ;;  %v2279_v53 = vld [vmem:[#allocation2 + $0x124] ss:$16 sps:$4 sm:$0xff]   ;;  %v2283_v54 = vld [vmem:[#allocation2 + $0x120] ss:$16 sps:$4 sm:$0xff]   ;;  %v2314_v57 = vld [vmem:[#allocation2 + $0xc] ss:$16 sps:$4 sm:$0xff]  }
  0x31   :  { %642 = vmatpush1.bf16.msra.mxu1 %v2291_v29  ;;  %673 = vmatprep.mubr.bf16.mxu1 %v1889_v25  ;;  %v2285_v56 = vld [vmem:[#allocation2 + $0x104] ss:$16 sps:$4 sm:$0xff]   ;;  %v2312_v58 = vld [vmem:[#allocation2 + $0x8] ss:$16 sps:$4 sm:$0xff]   ;;  %v2317_v59 = vld [vmem:[#allocation2 + $0x1ec] ss:$16 sps:$4 sm:$0xff]  }
  0x32   :  { %643 = vmatprep.subr.bf16.mxu1 %v2296_v30  ;;  %v554_v60 = vsel %vm546_vm0, %v2332_v52, 0  ;;  %v2288_v61 = vld [vmem:[#allocation2 + $0x100] ss:$16 sps:$4 sm:$0xff]   ;;  %v2330_v62 = vld [vmem:[#allocation2 + $0x24c] ss:$16 sps:$4 sm:$0x3f]  }
  0x33   :  { %570 = vmatpush1.bf16.msra.mxu0 %v2248_v14  ;;  %v2315_v63 = vld [vmem:[#allocation2 + $0x1e8] ss:$16 sps:$4 sm:$0xff]   ;;  %v2320_v1 = vld [vmem:[#allocation2 + $0x1cc] ss:$16 sps:$4 sm:$0xff]   ;;  %v2351_v22 = vld [vmem:[%s2866_s1 + $0x20] sm:$0xff]   ;;  %vm848_vm4 = vcmask 1043456  }
  0x34   :  { %571 = vmatprep.subr.bf16.mxu0 %v2249_v15  ;;  %v2338_v3 = vld [vmem:[#allocation2 + $0x22c] ss:$16 sps:$4 sm:$0xff]   ;;  %v2318_v4 = vld [vmem:[#allocation2 + $0x1c8] ss:$16 sps:$4 sm:$0xff]   ;;  %v2353_v25 = vld [vmem:[%s2866_s1 + $0x10] sm:$0xff]   ;;  %s2567_s12 = smov [#allocation7]  }
  0x35   :  { %644 = vmatpush1.bf16.msra.mxu1 %v2294_v33  ;;  %v2323_v5 = vld [vmem:[#allocation2 + $0x1ac] ss:$16 sps:$4 sm:$0xff]   ;;  %v2336_v6 = vld [vmem:[#allocation2 + $0x228] ss:$16 sps:$4 sm:$0xff]   ;;  %s1878_s13 = sshll.u32 %s2567_s12, 4  ;;  %s1879_s13 = int_to_ptr.vmem [resolvable:$true] %s1878_s13 }
  0x36   :  { %645 = vmatprep.subr.bf16.mxu1 %v2299_v34  ;;  %v2344_v7 = vld [vmem:[#allocation2 + $0x20c] ss:$16 sps:$4 sm:$0xff]   ;;  %v2321_v8 = vld [vmem:[#allocation2 + $0x1a8] ss:$16 sps:$4 sm:$0xff]   ;;  %p2537_p11 = scmp.lt.s32.totalorder %s1879_s13, %s1879_s13 }
  0x37   :  { %572 = vmatpush1.bf16.msra.mxu0 %v2251_v19  ;;  %v2326_v9 = vld [vmem:[#allocation2 + $0x18c] ss:$16 sps:$4 sm:$0xff]   ;;  %v2342_v10 = vld [vmem:[#allocation2 + $0x208] ss:$16 sps:$4 sm:$0xff]  }
  0x38   :  { %573 = vmatprep.subr.bf16.mxu0 %v2252_v21  ;;  %v2324_v11 = vld [vmem:[#allocation2 + $0x188] ss:$16 sps:$4 sm:$0xff]   ;;  %v2329_v12 = vld [vmem:[#allocation2 + $0x16c] ss:$16 sps:$4 sm:$0xff]  }
  0x39   :  { %646 = vmatpush1.bf16.msra.mxu1 %v2297_v37  ;;  %v2327_v14 = vld [vmem:[#allocation2 + $0x168] ss:$16 sps:$4 sm:$0xff]   ;;  %v2335_v15 = vld [vmem:[#allocation2 + $0x14c] ss:$16 sps:$4 sm:$0xff]  }
  0x3a   :  { %647 = vmatprep.subr.bf16.mxu1 %v2302_v38  ;;  %v2333_v17 = vld [vmem:[#allocation2 + $0x148] ss:$16 sps:$4 sm:$0xff]   ;;  %v2341_v18 = vld [vmem:[#allocation2 + $0x12c] ss:$16 sps:$4 sm:$0xff]  }
  0x3b   :  { %574 = vmatpush1.bf16.msra.mxu0 %v2254_v24  ;;  %v2350_v19 = vld [vmem:[%s2866_s1 + $0x28] sm:$0xff]   ;;  %v2352_v24 = vld [vmem:[%s2866_s1 + $0x18] sm:$0xff]  }
  0x3c   :  { %575 = vmatprep.subr.bf16.mxu0 %v2255_v27  ;;  %v2339_v20 = vld [vmem:[#allocation2 + $0x128] ss:$16 sps:$4 sm:$0xff]   ;;  %v2347_v21 = vld [vmem:[#allocation2 + $0x10c] ss:$16 sps:$4 sm:$0xff]   ;;  %v2355_v27 = vld [vmem:[%s2866_s1] sm:$0xff]  }
  0x3d   :  { %648 = vmatpush1.bf16.msra.mxu1 %v2300_v41  ;;  %v2345_v23 = vld [vmem:[#allocation2 + $0x108] ss:$16 sps:$4 sm:$0xff]  }
  0x3e   :  { %649 = vmatprep.subr.bf16.mxu1 %v2305_v42  ;;  %v2354_v26 = vld [vmem:[%s2866_s1 + $0x8] sm:$0xff]  }
  0x3f   :  { %576 = vmatpush2.bf16.msra.mxu0 %v2257_v31  ;;  %v134_v31 = vld [vmem:[%s2869_s4] sm:$0xf] }
  0x40   :  { %577 = vmatprep.subr.bf16.mxu0 %v2258_v32 }
  0x41   :  { %650 = vmatpush1.bf16.msra.mxu1 %v2303_v45 }
  0x42   :  { %651 = vmatprep.subr.bf16.mxu1 %v2308_v46 }
  0x43   :  { %578 = vmatpush2.bf16.msra.mxu0 %v2260_v35 }
  0x44   :  { %579 = vmatprep.subr.bf16.mxu0 %v2261_v36 }
  0x45   :  { %652 = vmatpush1.bf16.msra.mxu1 %v2306_v50 }
  0x46   :  { %653 = vmatprep.subr.bf16.mxu1 %v2311_v51 }
  0x47   :  { %580 = vmatpush2.bf16.msra.mxu0 %v2263_v39 }
  0x48   :  { %581 = vmatprep.subr.bf16.mxu0 %v2264_v40 }
  0x49   :  { %654 = vmatpush1.bf16.msra.mxu1 %v2309_v55 }
  0x4a   :  { %655 = vmatprep.subr.bf16.mxu1 %v2314_v57 }
  0x4b   :  { %582 = vmatpush2.bf16.msra.mxu0 %v2266_v43 }
  0x4c   :  { %583 = vmatprep.subr.bf16.mxu0 %v2267_v44 }
  0x4d   :  { %656 = vmatpush1.bf16.msra.mxu1 %v2312_v58 }
  0x4e   :  { %657 = vmatprep.subr.bf16.mxu1 %v2317_v59 }
  0x4f   :  { %584 = vmatpush2.bf16.msra.mxu0 %v2271_v47 }
  0x50   :  { %585 = vmatprep.subr.bf16.mxu0 %v2273_v48 }
  0x51   :  { %658 = vmatpush2.bf16.msra.mxu1 %v2315_v63 }
  0x52   :  { %659 = vmatprep.subr.bf16.mxu1 %v2320_v1 }
  0x53   :  { %586 = vmatpush2.bf16.msra.mxu0 %v2277_v49 }
  0x54   :  { %587 = vmatprep.subr.bf16.mxu0 %v2279_v53 }
  0x55   :  { %660 = vmatpush2.bf16.msra.mxu1 %v2318_v4 }
  0x56   :  { %661 = vmatprep.subr.bf16.mxu1 %v2323_v5 }
  0x57   :  { %588 = vmatpush2.bf16.msra.mxu0 %v2283_v54 }
  0x58   :  { %589 = vmatprep.subr.bf16.mxu0 %v2285_v56 }
  0x59   :  { %662 = vmatpush2.bf16.msra.mxu1 %v2321_v8 }
  0x5a   :  { %663 = vmatprep.subr.bf16.mxu1 %v2326_v9 }
  0x5b   :  { %590 = vmatpush2.bf16.msra.mxu0 %v2288_v61 }
  0x5c   :  { %1969 = vmatprep.subr.msk.bf16.mxu0 %vm546_vm0, %v2330_v62 }
  0x5d   :  { %664 = vmatpush2.bf16.msra.mxu1 %v2324_v11  ;;  %v743_v11 = vld [vmem:[%s2867_s2] sm:$0xf] }
  0x5e   :  { %592 = vmatmul.mubr.bf16.vlgmr.msra.gmra.mxu0 %v1888_v2  ;;  %665 = vmatprep.subr.bf16.mxu1 %v2329_v12  ;;  %v850_v12 = vsel %vm848_vm4, %v743_v11, 0 }
  0x5f   :  { %693 = vmatpush1.bf16.msra.mxu0 %v554_v60  ;;  %714 = vmatprep.mubr.bf16.mxu0 %v2564_v0  ;;  %v2349_v0 = vld [vmem:[%s2866_s1 + $0x30] sm:$0xff]  }
  0x60   :  { %694 = vmatprep.subr.bf16.mxu0 %v2338_v3 }
  0x61   :  { %666 = vmatpush2.bf16.msra.mxu1 %v2327_v14 }
  0x62   :  { %667 = vmatprep.subr.bf16.mxu1 %v2335_v15 }
  0x63   :  { %695 = vmatpush1.bf16.msra.mxu0 %v2336_v6 }
  0x64   :  { %696 = vmatprep.subr.bf16.mxu0 %v2344_v7 }
  0x65   :  { %668 = vmatpush2.bf16.msra.mxu1 %v2333_v17 }
  0x66   :  { %669 = vmatprep.subr.bf16.mxu1 %v2341_v18  ;;  %v2357_v18 = vld [vmem:[%s2866_s1 + $0x70] sm:$0xff]  }
  0x67   :  { %697 = vmatpush1.bf16.msra.mxu0 %v2342_v10 }
  0x68   :  { %2117 = vmatprep.subr.bf16.mxu0 %v2565_v16 }
  0x69   :  { %670 = vmatpush2.bf16.msra.mxu1 %v2339_v20  ;;  %v2359_v20 = vld [vmem:[%s2866_s1 + $0x60] sm:$0xff]  }
  0x6a   :  { %1970 = vmatmul.mubr.msk.bf16.vlgmr.msra.gmra.mxu0 %vm542_vm1, %v2627_v28  ;;  %671 = vmatprep.subr.bf16.mxu1 %v2347_v21  ;;  %v136_v28 = vlaneseq  ;;  %v2360_v21 = vld [vmem:[%s2866_s1 + $0x58] sm:$0xff]  }
  0x6b   :  { %2118 = vmatpush3.bf16.msra.mxu0 %v2348_v13  ;;  %2133 = vmatprep.mubr.msk.bf16.mxu0 %vm2566_vm2, %v2565_v16 }
  0x6c   :  { %2119 = vmatprep.subr.bf16.mxu0 %v2565_v16  ;;  %v2676_v29 = vshrl.u32 %v136_v28, 7 }
  0x6d   :  { %672 = vmatpush2.bf16.msra.mxu1 %v2345_v23  ;;  %v2362_v23 = vld [vmem:[%s2866_s1 + $0x48] sm:$0xff]  }
  0x6e   :  { %2137 = vmatprep.subr.bf16.mxu1 %v2565_v16  ;;  %v146_v30 = vsub.s32 2, %v2676_v29  ;;  %v150_v33 = vsub.s32 3, %v2676_v29  ;;  %v138_v39 = vsub.s32 0, %v2676_v29  ;;  %v142_v40 = vsub.s32 1, %v2676_v29 }
  0x6f   :  { %2120 = vmatpush3.bf16.msra.mxu0 %v2349_v0  ;;  %v2356_v0 = vld [vmem:[%s2866_s1 + $0x78] sm:$0xff]  }
  0x70   :  { %2121 = vmatprep.subr.bf16.mxu0 %v2565_v16  ;;  %674 = vmatmul.mubr.bf16.vlgmr.msra.gmra.mxu1 %v1888_v2  ;;  %v147_v32 = vrot.slane %v134_v31, %v146_v30  ;;  %v151_v34 = vrot.slane %v134_v31, %v150_v33  ;;  %v139_v41 = vrot.slane %v134_v31, %v138_v39 }
  0x71   :  { %2139 = vmatprep.mubr.msk.bf16.mxu1 %vm2566_vm2, %v2565_v16  ;;  %v143_v42 = vrot.slane %v134_v31, %v142_v40  ;;  %2138 = vmatpush3.bf16.msra.mxu1 %v850_v12 }
  0x72   :  { %2143 = vmatprep.subr.bf16.mxu1 %v2565_v16 }
  0x73   :  { %2122 = vmatpush3.bf16.msra.mxu0 %v2350_v19  ;;  %v2358_v19 = vld [vmem:[%s2866_s1 + $0x68] sm:$0xff]  }
  0x74   :  { %2123 = vmatprep.subr.bf16.mxu0 %v2565_v16 }
  0x77   :  { %2124 = vmatpush3.bf16.msra.mxu0 %v2351_v22  ;;  %v2361_v22 = vld [vmem:[%s2866_s1 + $0x50] sm:$0xff]  }
  0x78   :  { %2125 = vmatprep.subr.bf16.mxu0 %v2565_v16 }
  0x7b   :  { %2126 = vmatpush3.bf16.msra.mxu0 %v2352_v24  ;;  %v2363_v24 = vld [vmem:[%s2866_s1 + $0x40] sm:$0xff]  }
  0x7c   :  { %2127 = vmatprep.subr.bf16.mxu0 %v2565_v16 }
  0x7f   :  { %2128 = vmatpush3.bf16.msra.mxu0 %v2353_v25 }
  0x80   :  { %2129 = vmatprep.subr.bf16.mxu0 %v2565_v16 }
  0x83   :  { %2130 = vmatpush3.bf16.msra.mxu0 %v2354_v26 }
  0x84   :  { %2131 = vmatprep.subr.bf16.mxu0 %v2565_v16 }
  0x87   :  { %2132 = vmatpush3.bf16.msra.mxu0 %v2355_v27 }
  0x88   :  { %2163 = vmatprep.subr.bf16.mxu0 %v2565_v16 }
  0xf0   :  { %v634_v35 = vpop.f32.mrf.mxu1 }
  0xf2   :  { %v636_v36 = vpop.f32.mrf.mxu1 }
  0xf4   :  { %v638_v37 = vpop.f32.mrf.mxu1 }
  0xf6   :  { %v639_v38 = vpop.f32.mrf.mxu1 }
 0x11e   :  { %v593_v43 = vpop.f32.mrf.mxu0 }
 0x11f   :  { %v594_v44 = vadd.f32 %v593_v43, %v139_v41  ;;  %v909_v43 = vld [vmem:[%s2867_s2 + $0x4] sm:$0xf] }
 0x120   :  { %v595_v45 = vpop.f32.mrf.mxu0 }
 0x121   :  { %v635_v46 = vadd.f32 %v634_v35, %v594_v44  ;;  %v596_v47 = vadd.f32 %v595_v45, %v143_v42  ;;  %v1014_v44 = vsel %vm848_vm4, %v909_v43, 0 }
 0x122   :  { %v597_v48 = vpop.f32.mrf.mxu0 }
 0x123   :  { %v723_v49 = vpack.c.bf16 %v635_v46, %v635_v46  ;;  %v2689_v50 = vadd.f32 %v636_v36, %v596_v47  ;;  %v2364_v48 = vld [vmem:[%s2866_s1 + $0xb8] sm:$0xff]  }
 0x124   :  { %v598_v51 = vpop.f32.mrf.mxu0 }
 0x125   :  { %2134 = vmatmul.mubr.bf16.vlgmr.msra.gmra.mxu0 %v723_v49  ;;  %v724_v25 = vpack.c.bf16 %v2689_v50, %v2689_v50  ;;  %v2365_v50 = vld [vmem:[%s2866_s1 + $0xb0] sm:$0xff]   ;;  %v2366_v51 = vld [vmem:[%s2866_s1 + $0xa8] sm:$0xff]  }
 0x126   :  { %2165 = vmatprep.mubr.msk.bf16.mxu0 %vm2566_vm2, %v2565_v16  ;;  %2164 = vmatpush3.bf16.msra.mxu0 %v1014_v44  ;;  %v2428_v44 = vld [vmem:[#allocation5 + $0x170] ss:$8 sps:$4 sm:$0xff]  }
 0x127   :  { %2169 = vmatprep.subr.bf16.mxu0 %v2565_v16 }
 0x12a   :  { %v716_v52 = vpop.f32.mrf.mxu0 }
 0x12c   :  { %v718_v53 = vpop.f32.mrf.mxu0 }
 0x12e   :  { %v720_v54 = vpop.f32.mrf.mxu0 }
 0x12f   :  { %v2369_v54 = vld [vmem:[%s2866_s1 + $0x90] sm:$0xff]  }
 0x130   :  { %v721_v55 = vpop.f32.mrf.mxu0  ;;  %v675_v56 = vpop.f32.mrf.mxu1 }
 0x131   :  { %v676_v57 = vadd.f32 %v675_v56, %v147_v32  ;;  %v2370_v55 = vld [vmem:[%s2866_s1 + $0x88] sm:$0xff]   ;;  %v2371_v56 = vld [vmem:[%s2866_s1 + $0x80] sm:$0xff]  }
 0x132   :  { %v677_v58 = vpop.f32.mrf.mxu1 }
 0x133   :  { %v2693_v59 = vadd.f32 %v716_v52, %v676_v57  ;;  %v678_v60 = vadd.f32 %v677_v58, %v151_v34  ;;  %v2367_v52 = vld [vmem:[%s2866_s1 + $0xa0] sm:$0xff]  }
 0x134   :  { %v679_v61 = vpop.f32.mrf.mxu1 }
 0x135   :  { %v2695_v62 = vadd.f32 %v718_v53, %v678_v60  ;;  %v2368_v53 = vld [vmem:[%s2866_s1 + $0x98] sm:$0xff]   ;;  %v725_v57 = vpack.c.bf16 %v2693_v59, %v2693_v59 }
 0x136   :  { %v680_v63 = vpop.f32.mrf.mxu1 }
 0x1e5   :  { %v826_v1 = vpop.f32.mrf.mxu0 }
 0x1e6   :  { %v833_v2 = vsel %vm832_vm3, %v826_v1, -inf }
 0x1e7   :  { %834 = vmax.xlane.f32.xlu0 %v833_v2  ;;  %v2135_v3 = vpop.f32.mrf.mxu0 }
 0x1e9   :  { %v829_v4 = vpop.f32.mrf.mxu0 }
 0x1eb   :  { %v2136_v5 = vpop.f32.mrf.mxu0 }
 0x270   :  { %v835_v6 = vpop.xlane.xlu0 %834 }
 0x271   :  { %v836_v7 = vsub.f32 %v826_v1, %v835_v6 }
 0x273   :  { %v837_v8 = vmul.f32 1.442695, %v836_v7 }
 0x275   :  { %2476 = vpow2.f32 %v837_v8 }
 0x282   :  { %v2477_v9 = vpop.eup %2476 }
 0x283   :  { %v839_v10 = vsel %vm832_vm3, %v2477_v9, 0.0 }
 0x284   :  { %840 = vadd.xlane.f32.xlu0 %v839_v10  ;;  %v1073_v10 = vld [vmem:[%s2867_s2 + $0x8] sm:$0xf] }
 0x285   :  { %v1178_v11 = vsel %vm848_vm4, %v1073_v10, 0  ;;  %v2469_v10 = vld [vmem:[#allocation5 + $0x1a4] ss:$8 sps:$4 sm:$0xff]  }
 0x30d   :  { %v841_v13 = vpop.xlane.xlu0 %840 }
 0x30e   :  { %2478 = vrcp.f32 %v841_v13 }
 0x31b   :  { %v2479_v14 = vpop.eup %2478 }
 0x31c   :  { %v843_v15 = vmul.f32 %v2479_v14, %v2477_v9 }
 0x31e   :  { %v844_v17 = vpack.c.bf16 %v843_v15, %v843_v15  ;;  %v2372_v15 = vld [vmem:[%s2866_s1 + $0xf8] sm:$0xff]  }
 0x320   :  { %2140 = vmatmul.mubr.msk.bf16.vlgmr.msra.gmra.mxu1 %vm832_vm3, %v844_v17  ;;  %v2373_v17 = vld [vmem:[%s2866_s1 + $0xf0] sm:$0xff]  }
 0x321   :  { %2144 = vmatpush3.bf16.msra.mxu1 %v2356_v0  ;;  %2159 = vmatprep.mubr.msk.bf16.mxu1 %vm2566_vm2, %v2565_v16 }
 0x322   :  { %2145 = vmatprep.subr.bf16.mxu1 %v2565_v16 }
 0x325   :  { %2146 = vmatpush3.bf16.msra.mxu1 %v2357_v18  ;;  %v2374_v18 = vld [vmem:[%s2866_s1 + $0xe8] sm:$0xff]  }
 0x326   :  { %2147 = vmatprep.subr.bf16.mxu1 %v2565_v16 }
 0x329   :  { %2148 = vmatpush3.bf16.msra.mxu1 %v2358_v19  ;;  %v2375_v19 = vld [vmem:[%s2866_s1 + $0xe0] sm:$0xff]  }
 0x32a   :  { %2149 = vmatprep.subr.bf16.mxu1 %v2565_v16 }
 0x32d   :  { %2150 = vmatpush3.bf16.msra.mxu1 %v2359_v20  ;;  %v2376_v20 = vld [vmem:[%s2866_s1 + $0xd8] sm:$0xff]  }
 0x32e   :  { %2151 = vmatprep.subr.bf16.mxu1 %v2565_v16 }
 0x331   :  { %2152 = vmatpush3.bf16.msra.mxu1 %v2360_v21  ;;  %v2377_v21 = vld [vmem:[%s2866_s1 + $0xd0] sm:$0xff]  }
 0x332   :  { %2153 = vmatprep.subr.bf16.mxu1 %v2565_v16 }
 0x335   :  { %2154 = vmatpush3.bf16.msra.mxu1 %v2361_v22  ;;  %v2378_v22 = vld [vmem:[%s2866_s1 + $0xc8] sm:$0xff]  }
 0x336   :  { %2155 = vmatprep.subr.bf16.mxu1 %v2565_v16 }
 0x339   :  { %2156 = vmatpush3.bf16.msra.mxu1 %v2362_v23  ;;  %v2379_v23 = vld [vmem:[%s2866_s1 + $0xc0] sm:$0xff]  }
 0x33a   :  { %2157 = vmatprep.subr.bf16.mxu1 %v2565_v16 }
 0x33d   :  { %2158 = vmatpush3.bf16.msra.mxu1 %v2363_v24  ;;  %v726_v24 = vpack.c.bf16 %v2695_v62, %v2695_v62 }
 0x33e   :  { %2189 = vmatprep.subr.bf16.mxu1 %v2565_v16 }
 0x340   :  { %2160 = vmatmul.mubr.bf16.vlgmr.msra.gmra.mxu1 %v724_v25 }
 0x341   :  { %2191 = vmatprep.mubr.msk.bf16.mxu1 %vm2566_vm2, %v2565_v16  ;;  %2190 = vmatpush3.bf16.msra.mxu1 %v1178_v11  ;;  %v2467_v11 = vld [vmem:[#allocation5 + $0x1a0] ss:$8 sps:$4 sm:$0xff]  }
 0x342   :  { %2195 = vmatprep.subr.bf16.mxu1 %v2565_v16 }
 0x3e0   :  { %v2743_v26 = vpop.f32.mrf.mxu1 }
 0x3e2   :  { %v2141_v27 = vpop.f32.mrf.mxu1 }
 0x3e4   :  { %v889_v28 = vpop.f32.mrf.mxu1 }
 0x3e6   :  { %v2142_v30 = vpop.f32.mrf.mxu1 }
 0x400   :  { %v992_v31 = vpop.f32.mrf.mxu1 }
 0x401   :  { %v998_v32 = vsel %vm832_vm3, %v992_v31, -inf }
 0x402   :  { %999 = vmax.xlane.f32.xlu1 %v998_v32  ;;  %v2161_v33 = vpop.f32.mrf.mxu1 }
 0x404   :  { %v995_v34 = vpop.f32.mrf.mxu1 }
 0x406   :  { %v2162_v35 = vpop.f32.mrf.mxu1 }
 0x48b   :  { %v1000_v36 = vpop.xlane.xlu1 %999 }
 0x48c   :  { %v1001_v37 = vsub.f32 %v992_v31, %v1000_v36 }
 0x48e   :  { %v1002_v38 = vmul.f32 1.442695, %v1001_v37 }
 0x490   :  { %2480 = vpow2.f32 %v1002_v38 }
 0x49d   :  { %v2481_v41 = vpop.eup %2480 }
 0x49e   :  { %v1004_v42 = vsel %vm832_vm3, %v2481_v41, 0.0 }
 0x49f   :  { %1005 = vadd.xlane.f32.xlu1 %v1004_v42  ;;  %v2382_v42 = vld [vmem:[#allocation5 + $0x74] ss:$8 sps:$4 sm:$0xff]  }
 0x528   :  { %v1006_v45 = vpop.xlane.xlu1 %1005 }
 0x529   :  { %2482 = vrcp.f32 %v1006_v45  ;;  %v2430_v45 = vld [vmem:[#allocation5 + $0x174] ss:$8 sps:$4 sm:$0xff]  }
 0x536   :  { %v2483_v46 = vpop.eup %2482 }
 0x537   :  { %v1008_v47 = vmul.f32 %v2483_v46, %v2481_v41  ;;  %v1237_v41 = vld [vmem:[%s2867_s2 + $0xc] sm:$0xf] }
 0x538   :  { %v1342_v43 = vsel %vm848_vm4, %v1237_v41, 0  ;;  %v2433_v46 = vld [vmem:[#allocation5 + $0x164] ss:$8 sps:$4 sm:$0xff]  }
 0x539   :  { %v1009_v49 = vpack.c.bf16 %v1008_v47, %v1008_v47  ;;  %v2431_v47 = vld [vmem:[#allocation5 + $0x160] ss:$8 sps:$4 sm:$0xff]   ;;  %v2415_v41 = vld [vmem:[#allocation5 + $0xc4] ss:$8 sps:$4 sm:$0xff]  }
 0x53b   :  { %2166 = vmatmul.mubr.msk.bf16.vlgmr.msra.gmra.mxu0 %vm832_vm3, %v1009_v49  ;;  %v2434_v49 = vld [vmem:[#allocation5 + $0x150] ss:$8 sps:$4 sm:$0xff]  }
 0x53c   :  { %2170 = vmatpush3.bf16.msra.mxu0 %v2364_v48  ;;  %2185 = vmatprep.mubr.msk.bf16.mxu0 %vm2566_vm2, %v2565_v16  ;;  %v2436_v48 = vld [vmem:[#allocation5 + $0x154] ss:$8 sps:$4 sm:$0xff]  }
 0x53d   :  { %2171 = vmatprep.subr.bf16.mxu0 %v2565_v16 }
 0x540   :  { %2172 = vmatpush3.bf16.msra.mxu0 %v2365_v50  ;;  %v2439_v50 = vld [vmem:[#allocation5 + $0x144] ss:$8 sps:$4 sm:$0xff]  }
 0x541   :  { %2173 = vmatprep.subr.bf16.mxu0 %v2565_v16 }
 0x544   :  { %2174 = vmatpush3.bf16.msra.mxu0 %v2366_v51  ;;  %v2437_v51 = vld [vmem:[#allocation5 + $0x140] ss:$8 sps:$4 sm:$0xff]  }
 0x545   :  { %2175 = vmatprep.subr.bf16.mxu0 %v2565_v16 }
 0x548   :  { %2176 = vmatpush3.bf16.msra.mxu0 %v2367_v52  ;;  %v2442_v52 = vld [vmem:[#allocation5 + $0x134] ss:$8 sps:$4 sm:$0xff]  }
 0x549   :  { %2177 = vmatprep.subr.bf16.mxu0 %v2565_v16 }
 0x54c   :  { %2178 = vmatpush3.bf16.msra.mxu0 %v2368_v53  ;;  %v2440_v53 = vld [vmem:[#allocation5 + $0x130] ss:$8 sps:$4 sm:$0xff]  }
 0x54d   :  { %2179 = vmatprep.subr.bf16.mxu0 %v2565_v16 }
 0x550   :  { %2180 = vmatpush3.bf16.msra.mxu0 %v2369_v54  ;;  %v2445_v54 = vld [vmem:[#allocation5 + $0x124] ss:$8 sps:$4 sm:$0xff]  }
 0x551   :  { %2181 = vmatprep.subr.bf16.mxu0 %v2565_v16 }
 0x554   :  { %2182 = vmatpush3.bf16.msra.mxu0 %v2370_v55  ;;  %v2443_v55 = vld [vmem:[#allocation5 + $0x120] ss:$8 sps:$4 sm:$0xff]  }
 0x555   :  { %2183 = vmatprep.subr.bf16.mxu0 %v2565_v16 }
 0x558   :  { %2184 = vmatpush3.bf16.msra.mxu0 %v2371_v56  ;;  %v2448_v56 = vld [vmem:[#allocation5 + $0x114] ss:$8 sps:$4 sm:$0xff]  }
 0x559   :  { %2215 = vmatprep.subr.bf16.mxu0 %v2565_v16 }
 0x55b   :  { %2186 = vmatmul.mubr.bf16.vlgmr.msra.gmra.mxu0 %v725_v57  ;;  %v2446_v57 = vld [vmem:[#allocation5 + $0x110] ss:$8 sps:$4 sm:$0xff]  }
 0x55c   :  { %2217 = vmatprep.mubr.msk.bf16.mxu0 %vm2566_vm2, %v2565_v16  ;;  %2216 = vmatpush3.bf16.msra.mxu0 %v1342_v43  ;;  %v2418_v43 = vld [vmem:[#allocation5 + $0xb4] ss:$8 sps:$4 sm:$0xff]  }
 0x55d   :  { %1781 = vmatprep.subr.bf16.mxu0 %v2382_v42  ;;  %v2413_v42 = vld [vmem:[#allocation5 + $0xc0] ss:$8 sps:$4 sm:$0xff]  }
 0x5fb   :  { %v2791_v58 = vpop.f32.mrf.mxu0 }
 0x5fd   :  { %v2167_v60 = vpop.f32.mrf.mxu0 }
 0x5fe   :  { %v2451_v60 = vld [vmem:[#allocation5 + $0x104] ss:$8 sps:$4 sm:$0xff]  }
 0x5ff   :  { %v1053_v61 = vpop.f32.mrf.mxu0 }
 0x600   :  { %v2449_v61 = vld [vmem:[#allocation5 + $0x100] ss:$8 sps:$4 sm:$0xff]  }
 0x601   :  { %v2168_v63 = vpop.f32.mrf.mxu0 }
 0x602   :  { %v2454_v63 = vld [vmem:[#allocation5 + $0x1f4] ss:$8 sps:$4 sm:$0xff]  }
 0x61b   :  { %v1156_v1 = vpop.f32.mrf.mxu0 }
 0x61c   :  { %v1162_v2 = vsel %vm832_vm3, %v1156_v1, -inf }
 0x61d   :  { %1163 = vmax.xlane.f32.xlu0 %v1162_v2  ;;  %v2187_v3 = vpop.f32.mrf.mxu0  ;;  %v2457_v2 = vld [vmem:[#allocation5 + $0x1e4] ss:$8 sps:$4 sm:$0xff]  }
 0x61e   :  { %v2455_v3 = vld [vmem:[#allocation5 + $0x1e0] ss:$8 sps:$4 sm:$0xff]  }
 0x61f   :  { %v1159_v4 = vpop.f32.mrf.mxu0 }
 0x620   :  { %v2460_v4 = vld [vmem:[#allocation5 + $0x1d4] ss:$8 sps:$4 sm:$0xff]  }
 0x621   :  { %v2188_v5 = vpop.f32.mrf.mxu0 }
 0x622   :  { %v2458_v5 = vld [vmem:[#allocation5 + $0x1d0] ss:$8 sps:$4 sm:$0xff]  }
 0x6a6   :  { %v1164_v6 = vpop.xlane.xlu0 %1163 }
 0x6a7   :  { %v1165_v59 = vsub.f32 %v1156_v1, %v1164_v6  ;;  %v2452_v1 = vld [vmem:[#allocation5 + $0x1f0] ss:$8 sps:$4 sm:$0xff]   ;;  %v2463_v6 = vld [vmem:[#allocation5 + $0x1c4] ss:$8 sps:$4 sm:$0xff]  }
 0x6a9   :  { %v1166_v7 = vmul.f32 1.442695, %v1165_v59  ;;  %v2461_v59 = vld [vmem:[#allocation5 + $0x1c0] ss:$8 sps:$4 sm:$0xff]  }
 0x6ab   :  { %2484 = vpow2.f32 %v1166_v7  ;;  %v2466_v7 = vld [vmem:[#allocation5 + $0x1b4] ss:$8 sps:$4 sm:$0xff]  }
 0x6b8   :  { %v2485_v8 = vpop.eup %2484 }
 0x6b9   :  { %v1168_v9 = vsel %vm832_vm3, %v2485_v8, 0.0 }
 0x6ba   :  { %1169 = vadd.xlane.f32.xlu1 %v1168_v9  ;;  %v2464_v9 = vld [vmem:[#allocation5 + $0x1b0] ss:$8 sps:$4 sm:$0xff]  }
 0x743   :  { %v1170_v12 = vpop.xlane.xlu1 %1169 }
 0x744   :  { %2486 = vrcp.f32 %v1170_v12  ;;  %v2472_v12 = vld [vmem:[#allocation5 + $0x194] ss:$8 sps:$4 sm:$0xff]  }
 0x751   :  { %v2487_v13 = vpop.eup %2486 }
 0x752   :  { %v1172_v14 = vmul.f32 %v2487_v13, %v2485_v8  ;;  %v2470_v13 = vld [vmem:[#allocation5 + $0x190] ss:$8 sps:$4 sm:$0xff]  }
 0x754   :  { %v1173_v0 = vpack.c.bf16 %v1172_v14, %v1172_v14 }
 0x756   :  { %2192 = vmatmul.mubr.msk.bf16.vlgmr.msra.gmra.mxu1 %vm832_vm3, %v1173_v0  ;;  %v2380_v0 = vld [vmem:[#allocation5 + $0x70] ss:$8 sps:$4 sm:$0xff]  }
 0x757   :  { %2196 = vmatpush3.bf16.msra.mxu1 %v2372_v15  ;;  %2211 = vmatprep.mubr.msk.bf16.mxu1 %vm2566_vm2, %v2565_v16 }
 0x758   :  { %2197 = vmatprep.subr.bf16.mxu1 %v2565_v16 }
 0x75b   :  { %2198 = vmatpush3.bf16.msra.mxu1 %v2373_v17 }
 0x75c   :  { %2199 = vmatprep.subr.bf16.mxu1 %v2565_v16 }
 0x75f   :  { %2200 = vmatpush3.bf16.msra.mxu1 %v2374_v18  ;;  %v2385_v18 = vld [vmem:[#allocation5 + $0x64] ss:$8 sps:$4 sm:$0xff]  }
 0x760   :  { %2201 = vmatprep.subr.bf16.mxu1 %v2565_v16 }
 0x763   :  { %2202 = vmatpush3.bf16.msra.mxu1 %v2375_v19  ;;  %v1056_v19 = vpack.c.bf16 %v2791_v58, %v2791_v58  ;;  %v2395_v58 = vld [vmem:[#allocation5 + $0x20] ss:$8 sps:$4 sm:$0xff]  }
 0x764   :  { %2203 = vmatprep.subr.bf16.mxu1 %v2565_v16 }
 0x767   :  { %2204 = vmatpush3.bf16.msra.mxu1 %v2376_v20  ;;  %v2383_v20 = vld [vmem:[#allocation5 + $0x60] ss:$8 sps:$4 sm:$0xff]  }
 0x768   :  { %2205 = vmatprep.subr.bf16.mxu1 %v2565_v16 }
 0x76b   :  { %2206 = vmatpush3.bf16.msra.mxu1 %v2377_v21  ;;  %v2388_v21 = vld [vmem:[#allocation5 + $0x54] ss:$8 sps:$4 sm:$0xff]  }
 0x76c   :  { %2207 = vmatprep.subr.bf16.mxu1 %v2565_v16 }
 0x76f   :  { %2208 = vmatpush3.bf16.msra.mxu1 %v2378_v22  ;;  %v2386_v22 = vld [vmem:[#allocation5 + $0x50] ss:$8 sps:$4 sm:$0xff]  }
 0x770   :  { %2209 = vmatprep.subr.bf16.mxu1 %v2565_v16 }
 0x773   :  { %2210 = vmatpush3.bf16.msra.mxu1 %v2379_v23  ;;  %v2391_v23 = vld [vmem:[#allocation5 + $0x44] ss:$8 sps:$4 sm:$0xff]  }
 0x774   :  { %1822 = vmatprep.subr.bf16.mxu1 %v2430_v45  ;;  %v2421_v45 = vld [vmem:[#allocation5 + $0xa4] ss:$8 sps:$4 sm:$0xff]  }
 0x776   :  { %2212 = vmatmul.mubr.bf16.vlgmr.msra.gmra.mxu1 %v726_v24  ;;  %v2389_v24 = vld [vmem:[#allocation5 + $0x40] ss:$8 sps:$4 sm:$0xff]  }
 0x777   :  { %1823 = vmatpush1.bf16.msra.mxu1 %v2428_v44  ;;  %v2416_v44 = vld [vmem:[#allocation5 + $0xb0] ss:$8 sps:$4 sm:$0xff]  }
 0x778   :  { %1824 = vmatprep.subr.bf16.mxu1 %v2433_v46  ;;  %v2419_v46 = vld [vmem:[#allocation5 + $0xa0] ss:$8 sps:$4 sm:$0xff]  }
 0x77b   :  { %1825 = vmatpush1.bf16.msra.mxu1 %v2431_v47  ;;  %v2424_v47 = vld [vmem:[#allocation5 + $0x94] ss:$8 sps:$4 sm:$0xff]  }
 0x77c   :  { %1826 = vmatprep.subr.bf16.mxu1 %v2436_v48  ;;  %v2422_v48 = vld [vmem:[#allocation5 + $0x90] ss:$8 sps:$4 sm:$0xff]  }
 0x77f   :  { %1827 = vmatpush1.bf16.msra.mxu1 %v2434_v49  ;;  %v2427_v49 = vld [vmem:[#allocation5 + $0x84] ss:$8 sps:$4 sm:$0xff]  }
 0x780   :  { %1828 = vmatprep.subr.bf16.mxu1 %v2439_v50  ;;  %v2425_v50 = vld [vmem:[#allocation5 + $0x80] ss:$8 sps:$4 sm:$0xff]  }
 0x783   :  { %1829 = vmatpush1.bf16.msra.mxu1 %v2437_v51  ;;  %v892_v51 = vpack.c.bf16 %v2743_v26, %v2743_v26  ;;  %v1449_v26 = vld [vmem:[%s2871_s6] sm:$0x3]  ;;  %s2532_s6 = scalar_lea.vmem %s1879_s13, 128 }
 0x784   :  { %1830 = vmatprep.subr.bf16.mxu1 %v2442_v52  ;;  %v2475_v52 = vld [vmem:[#allocation5 + $0x184] ss:$8 sps:$4 sm:$0xff]   ;;  %p2533_p10 = scmp.ne.s32.totalorder %s1879_s13, %s2532_s6  ;;  %p2538_p12 = scmp.lt.s32.totalorder %s2532_s6, %s2532_s6 }
 0x786   :  { %p2539_p13 = por %p2538_p12, %p2537_p11 }
 0x787   :  { %1831 = vmatpush1.bf16.msra.mxu1 %v2440_v53  ;;  %v2473_v53 = vld [vmem:[#allocation5 + $0x180] ss:$8 sps:$4 sm:$0xff]  }
 0x788   :  { %1832 = vmatprep.subr.bf16.mxu1 %v2445_v54  ;;  %p2540_p0 = pnand %p2539_p13, %p2533_p10 }
 0x78b   :  { %1833 = vmatpush1.bf16.msra.mxu1 %v2443_v55 }
 0x78c   :  { %1834 = vmatprep.subr.bf16.mxu1 %v2448_v56 }
 0x78f   :  { %1835 = vmatpush1.bf16.msra.mxu1 %v2446_v57 }
 0x790   :  { %1836 = vmatprep.subr.bf16.mxu1 %v2451_v60 }
 0x793   :  { %1837 = vmatpush1.bf16.msra.mxu1 %v2449_v61 }
 0x794   :  { %1838 = vmatprep.subr.bf16.mxu1 %v2454_v63 }
 0x797   :  { %1839 = vmatpush2.bf16.msra.mxu1 %v2452_v1 }
 0x798   :  { %1840 = vmatprep.subr.bf16.mxu1 %v2457_v2 }
 0x79b   :  { %1841 = vmatpush2.bf16.msra.mxu1 %v2455_v3 }
 0x79c   :  { %1842 = vmatprep.subr.bf16.mxu1 %v2460_v4  ;;  %v1454_v4 = vrot.slane %v1449_v26, %v138_v39 }
 0x79f   :  { %1843 = vmatpush2.bf16.msra.mxu1 %v2458_v5  ;;  %v1458_v5 = vrot.slane %v1449_v26, %v142_v40 }
 0x7a0   :  { %1844 = vmatprep.subr.bf16.mxu1 %v2463_v6 }
 0x7a3   :  { %1845 = vmatpush2.bf16.msra.mxu1 %v2461_v59 }
 0x7a4   :  { %1846 = vmatprep.subr.bf16.mxu1 %v2466_v7 }
 0x7a7   :  { %1847 = vmatpush2.bf16.msra.mxu1 %v2464_v9 }
 0x7a8   :  { %1848 = vmatprep.subr.bf16.mxu1 %v2469_v10 }
 0x7ab   :  { %1849 = vmatpush2.bf16.msra.mxu1 %v2467_v11 }
 0x7ac   :  { %1850 = vmatprep.subr.bf16.mxu1 %v2472_v12 }
 0x7af   :  { %1851 = vmatpush2.bf16.msra.mxu1 %v2470_v13 }
 0x7b0   :  { %1852 = vmatprep.subr.bf16.mxu1 %v2475_v52 }
 0x7b3   :  { %1853 = vmatpush2.bf16.msra.mxu1 %v2473_v53 }
 0x816   :  { %v2836_v25 = vpop.f32.mrf.mxu1 }
 0x817   :  { %v1220_v56 = vpack.c.bf16 %v2836_v25, %v2836_v25 }
 0x818   :  { %v2193_v27 = vpop.f32.mrf.mxu1 }
 0x819   :  { %v2394_v27 = vld [vmem:[#allocation5 + $0x34] ss:$8 sps:$4 sm:$0xff]  }
 0x81a   :  { %v1217_v28 = vpop.f32.mrf.mxu1 }
 0x81b   :  { %v2392_v28 = vld [vmem:[#allocation5 + $0x30] ss:$8 sps:$4 sm:$0xff]  }
 0x81c   :  { %v2194_v30 = vpop.f32.mrf.mxu1 }
 0x81d   :  { %v2397_v30 = vld [vmem:[#allocation5 + $0x24] ss:$8 sps:$4 sm:$0xff]  }
 0x836   :  { %v1320_v31 = vpop.f32.mrf.mxu1 }
 0x837   :  { %v1326_v32 = vsel %vm832_vm3, %v1320_v31, -inf }
 0x838   :  { %1327 = vmax.xlane.f32.xlu0 %v1326_v32  ;;  %v2213_v33 = vpop.f32.mrf.mxu1  ;;  %v2398_v32 = vld [vmem:[#allocation5 + $0x10] ss:$8 sps:$4 sm:$0xff]  }
 0x839   :  { %v2403_v33 = vld [vmem:[#allocation5 + $0x4] ss:$8 sps:$4 sm:$0xff]  }
 0x83a   :  { %v1323_v34 = vpop.f32.mrf.mxu1 }
 0x83b   :  { %v2401_v34 = vld [vmem:[#allocation5] ss:$8 sps:$4 sm:$0xff]  }
 0x83c   :  { %v2214_v35 = vpop.f32.mrf.mxu1 }
 0x83d   :  { %v2406_v35 = vld [vmem:[#allocation5 + $0xf4] ss:$8 sps:$4 sm:$0xff]  }
 0x8c1   :  { %v1328_v36 = vpop.xlane.xlu0 %1327 }
 0x8c2   :  { %v1329_v37 = vsub.f32 %v1320_v31, %v1328_v36  ;;  %v2400_v31 = vld [vmem:[#allocation5 + $0x14] ss:$8 sps:$4 sm:$0xff]   ;;  %v2404_v36 = vld [vmem:[#allocation5 + $0xf0] ss:$8 sps:$4 sm:$0xff]  }
 0x8c4   :  { %v1330_v16 = vmul.f32 1.442695, %v1329_v37  ;;  %v2409_v37 = vld [vmem:[#allocation5 + $0xe4] ss:$8 sps:$4 sm:$0xff]  }
 0x8c6   :  { %2488 = vpow2.f32 %v1330_v16  ;;  %v2407_v16 = vld [vmem:[#allocation5 + $0xe0] ss:$8 sps:$4 sm:$0xff]  }
 0x8d3   :  { %v2839_v38 = vpop.eup %2488 }
 0x8d4   :  { %v1332_v62 = vsel %vm832_vm3, %v2839_v38, 0.0 }
 0x8d5   :  { %1333 = vadd.xlane.f32.xlu1 %v1332_v62  ;;  %v2410_v62 = vld [vmem:[#allocation5 + $0xd0] ss:$8 sps:$4 sm:$0xff]  }
 0x95e   :  { %v1334_v8 = vpop.xlane.xlu1 %1333 }
 0x95f   :  { %2490 = vrcp.f32 %v1334_v8 }
 0x96c   :  { %v2491_v14 = vpop.eup %2490 }
 0x96d   :  { %v1336_v15 = vmul.f32 %v2491_v14, %v2839_v38  ;;  %v2412_v38 = vld [vmem:[#allocation5 + $0xd4] ss:$8 sps:$4 sm:$0xff]  }
 0x96f   :  { %v1337_v17 = vpack.c.bf16 %v1336_v15, %v1336_v15 }
 0x971   :  { %2218 = vmatmul.mubr.msk.bf16.vlgmr.msra.gmra.mxu0 %vm832_vm3, %v1337_v17 }
 0x972   :  { %1782 = vmatpush1.bf16.msra.mxu0 %v2380_v0  ;;  %1813 = vmatprep.mubr.bf16.mxu0 %v1056_v19 }
 0x973   :  { %1783 = vmatprep.subr.bf16.mxu0 %v2385_v18 }
 0x976   :  { %1784 = vmatpush1.bf16.msra.mxu0 %v2383_v20 }
 0x977   :  { %1785 = vmatprep.subr.bf16.mxu0 %v2388_v21 }
 0x97a   :  { %1786 = vmatpush1.bf16.msra.mxu0 %v2386_v22 }
 0x97b   :  { %1787 = vmatprep.subr.bf16.mxu0 %v2391_v23 }
 0x97e   :  { %1788 = vmatpush1.bf16.msra.mxu0 %v2389_v24 }
 0x97f   :  { %1789 = vmatprep.subr.bf16.mxu0 %v2394_v27 }
 0x982   :  { %1790 = vmatpush1.bf16.msra.mxu0 %v2392_v28 }
 0x983   :  { %1791 = vmatprep.subr.bf16.mxu0 %v2397_v30 }
 0x986   :  { %1792 = vmatpush1.bf16.msra.mxu0 %v2395_v58 }
 0x987   :  { %1793 = vmatprep.subr.bf16.mxu0 %v2400_v31 }
 0x98a   :  { %1794 = vmatpush1.bf16.msra.mxu0 %v2398_v32 }
 0x98b   :  { %1795 = vmatprep.subr.bf16.mxu0 %v2403_v33 }
 0x98e   :  { %1796 = vmatpush1.bf16.msra.mxu0 %v2401_v34 }
 0x98f   :  { %1797 = vmatprep.subr.bf16.mxu0 %v2406_v35 }
 0x992   :  { %1798 = vmatpush2.bf16.msra.mxu0 %v2404_v36 }
 0x993   :  { %1799 = vmatprep.subr.bf16.mxu0 %v2409_v37 }
 0x996   :  { %1800 = vmatpush2.bf16.msra.mxu0 %v2407_v16 }
 0x997   :  { %1801 = vmatprep.subr.bf16.mxu0 %v2412_v38 }
 0x99a   :  { %1802 = vmatpush2.bf16.msra.mxu0 %v2410_v62 }
 0x99b   :  { %1803 = vmatprep.subr.bf16.mxu0 %v2415_v41 }
 0x99e   :  { %1804 = vmatpush2.bf16.msra.mxu0 %v2413_v42 }
 0x99f   :  { %1805 = vmatprep.subr.bf16.mxu0 %v2418_v43 }
 0x9a2   :  { %1806 = vmatpush2.bf16.msra.mxu0 %v2416_v44 }
 0x9a3   :  { %1807 = vmatprep.subr.bf16.mxu0 %v2421_v45 }
 0x9a6   :  { %1808 = vmatpush2.bf16.msra.mxu0 %v2419_v46 }
 0x9a7   :  { %1809 = vmatprep.subr.bf16.mxu0 %v2424_v47 }
 0x9aa   :  { %1810 = vmatpush2.bf16.msra.mxu0 %v2422_v48 }
 0x9ab   :  { %1811 = vmatprep.subr.bf16.mxu0 %v2427_v49 }
 0x9ae   :  { %1812 = vmatpush2.bf16.msra.mxu0 %v2425_v50 }
 0x9b1   :  { %1814 = vmatmul.mubr.bf16.vlgmr.msra.gmra.mxu0 %v892_v51 }
 0xa31   :  { %v1378_v54 = vpop.f32.mrf.mxu0 }
 0xa32   :  { %v1384_v55 = vpack.c.bf16 %v1378_v54, %v1378_v54 }
 0xa33   :  { %v2219_v57 = vpop.f32.mrf.mxu0 }
 0xa34   :  { %1854 = vmatprep.mubr.bf16.mxu1 %v1384_v55 }
 0xa35   :  { %v1381_v60 = vpop.f32.mrf.mxu0  ;;  %1855 = vmatmul.mubr.bf16.vlgmr.msra.gmra.mxu1 %v1220_v56 }
 0xa37   :  { %v2220_v61 = vpop.f32.mrf.mxu0 }
 0xa71   :  { %v1815_v63 = vpop.f32.mrf.mxu0 }
 0xa72   :  { %v1816_v6 = vadd.f32 %v1815_v63, %v1454_v4 }
 0xa73   :  { %v1817_v1 = vpop.f32.mrf.mxu0 }
 0xa74   :  { %v1818_v59 = vadd.f32 %v1817_v1, %v1458_v5 }
 0xa75   :  { %v1819_v2 = vpop.f32.mrf.mxu0 }
 0xa77   :  { %v1820_v3 = vpop.f32.mrf.mxu0 }
 0xaf5   :  { %v1856_v25 = vpop.f32.mrf.mxu1 }
 0xaf6   :  { %v1857_v8 = vadd.f32 %v1856_v25, %v1816_v6 }
 0xaf7   :  { %v1858_v7 = vpop.f32.mrf.mxu1 }
 0xaf8   :  { %v1859_v9 = vadd.f32 %v1858_v7, %v1818_v59 }
 0xaf9   :  { %v1860_v10 = vpop.f32.mrf.mxu1 }
 0xafa   :  { %v2072_v11 = vpack.c.bf16 %v1859_v9, %v1857_v8 }
 0xafb   :  { %v1861_v12 = vpop.f32.mrf.mxu1 }
 0xafc   :  { %1871 = vst [vmem:[#allocation7] sm:$0xff] %v2072_v11 }
 0xafd   :  { %2543 = shalt.err (!%p2540_p0)
}
 0xafe   :  { %1881 = dma.vmem_to_hbm [thread:$0]  %s1879_s13, 128, %s2872_s7, [#allocation4]  }
 0xaff   :  { %2556 = dma.done.wait [#allocation4], 128  }
 0xb00   :  { %2557 = vsyncadd [#allocation4], 4294967168 }
 0xb01   :  { %1885 = vsyncpa [#allocation3], 1 }
 0xb02   :  { %1886 = vsyncpa [#allocation6], 1 }
 0xb03   :  { %1887 = vsyncpa [#allocation4], 1 }

</bundles_post_ra>
